<compile_context>
chip_gen: v7x
topology: tpu7x:2x2x1
jax: 0.10.0
libtpu: 0.0.40
codegen_flags: <defaults>
</compile_context>

<pallas_src>
import math
import numpy as np
import jax
import jax.numpy as jnp
from jax.experimental import pallas as pl
from jax.experimental.pallas import tpu as pltpu


def _pick_tile(n, prefs):
    for t in prefs:
        if n % t == 0:
            return t
    return n


def _round_up(n, m):
    return -(-n // m) * m


# ---------------------------------------------------------------------------
# Linear projection: y = x @ w.T  (w in torch Linear layout (H_out, H_in)).
# Tiled NT matmul, f32 VMEM accumulator, selectable output dtype.
# ---------------------------------------------------------------------------
def _linear_kernel(x_ref, w_ref, o_ref, acc_ref):
    @pl.when(pl.program_id(2) == 0)
    def _init():
        acc_ref[...] = jnp.zeros_like(acc_ref)

    acc_ref[...] += jax.lax.dot_general(
        x_ref[...], w_ref[...],
        dimension_numbers=(((1,), (1,)), ((), ())),
        preferred_element_type=jnp.float32)

    @pl.when(pl.program_id(2) == pl.num_programs(2) - 1)
    def _done():
        o_ref[...] = acc_ref[...].astype(o_ref.dtype)


def linear_nobias(x, w, out_dtype=None):
    out_dtype = out_dtype or x.dtype
    lead, h_in = x.shape[:-1], x.shape[-1]
    h_out = w.shape[0]
    x2 = x.reshape(-1, h_in)
    n = x2.shape[0]
    bm = _pick_tile(n, (512, 256, 128, 64, 32, 16, 8))
    bn = _pick_tile(h_out, (512, 256, 128))
    bk = _pick_tile(h_in, (512, 256, 128))
    out = pl.pallas_call(
        _linear_kernel,
        out_shape=jax.ShapeDtypeStruct((n, h_out), out_dtype),
        grid=(n // bm, h_out // bn, h_in // bk),
        in_specs=[pl.BlockSpec((bm, bk), lambda i, j, k: (i, k)),
                  pl.BlockSpec((bn, bk), lambda i, j, k: (j, k))],
        out_specs=pl.BlockSpec((bm, bn), lambda i, j, k: (i, j)),
        scratch_shapes=[pltpu.VMEM((bm, bn), jnp.float32)],
        compiler_params=pltpu.CompilerParams(
            dimension_semantics=("parallel", "parallel", "arbitrary"),
            vmem_limit_bytes=48 * 1024 * 1024),
    )(x2, w)
    return out.reshape(lead + (h_out,))


# ---------------------------------------------------------------------------
# Skew: place qp[m, j] at window column m + j of a (tq, width) tile, zeros
# elsewhere.  Implemented as a cyclic right-rotation of row m by m over
# `width` lanes via a log2(tq)-step barrel shifter built only from static
# lane slices + concatenates + selects (guaranteed lowering, O(log tq) steps).
# Wrapped entries land in the zero padding because width - span_p == tq > m.
# ---------------------------------------------------------------------------
def _skew_band(qp, tq, width):
    span_p = qp.shape[-1]
    x = jnp.concatenate(
        [qp, jnp.zeros((tq, width - span_p), qp.dtype)], axis=-1)
    row = jax.lax.broadcasted_iota(jnp.int32, (tq, width), 0)
    shift = 1
    while shift < tq:
        rot = jnp.concatenate(
            [x[:, width - shift:], x[:, :width - shift]], axis=-1)
        x = jnp.where((row & shift) != 0, rot, x)
        shift *= 2
    return x


# ---------------------------------------------------------------------------
# Full-window banded multi-head attention kernel.
# grid = (B, M_p // tq); one step = all heads of one (batch, query-tile)
# against the whole (tq + span_p) key/value window -> single softmax, single
# P@V per head.
# ---------------------------------------------------------------------------
def _make_attn_kernel(nheads, d_head, span, span_p, tq):
    width = tq + span_p
    nw = span_p // tq + 1
    scale = 1.0 / math.sqrt(d_head)

    def kernel(*refs):
        q_ref = refs[0]
        k_refs = refs[1:1 + nw]
        v_refs = refs[1 + nw:1 + 2 * nw]
        pe_ref = refs[1 + 2 * nw]
        o_ref = refs[2 + 2 * nw]

        # Assemble the full (width, H) K/V window for this query tile once.
        kw = jnp.concatenate([k_refs[w][0] for w in range(nw)], axis=0)
        vw = jnp.concatenate([v_refs[w][0] for w in range(nw)], axis=0)

        # Band mask: window column c of query row m has relative offset
        # j = c - m which must satisfy 0 <= j < span (original, unpadded).
        row = jax.lax.broadcasted_iota(jnp.int32, (tq, width), 0)
        col = jax.lax.broadcasted_iota(jnp.int32, (tq, width), 1)
        rel = col - row
        band = (rel >= 0) & (rel < span)

        pe = pe_ref[...]                                   # (D, span_p) bf16

        # NOTE: python-unrolled head loop is fine for <= ~4-8 heads; for large
        # head counts move heads onto a grid axis to bound vreg live ranges.
        for h in range(nheads):
            lo = h * d_head
            qh = q_ref[0, :, lo:lo + d_head].astype(jnp.float32) * scale
            qh = qh.astype(jnp.bfloat16)                   # (tq, D)
            kh = kw[:, lo:lo + d_head]                     # (width, D) bf16
            vh = vw[:, lo:lo + d_head]                     # (width, D) bf16

            s = jax.lax.dot_general(                       # content: (tq, width)
                qh, kh, dimension_numbers=(((1,), (1,)), ((), ())),
                preferred_element_type=jnp.float32)
            qp = jax.lax.dot_general(                      # positional: (tq, span_p)
                qh, pe, dimension_numbers=(((1,), (0,)), ((), ())),
                preferred_element_type=jnp.float32)
            s = s + _skew_band(qp, tq, width)
            s = jnp.where(band, s, -1e30)

            m = jnp.max(s, axis=-1, keepdims=True)
            p = jnp.exp(s - m)
            l = jnp.sum(p, axis=-1, keepdims=True)
            out_h = jax.lax.dot_general(                   # (tq, D)
                p.astype(jnp.bfloat16), vh,
                dimension_numbers=(((1,), (0,)), ((), ())),
                preferred_element_type=jnp.float32)
            out_h = out_h * pl.reciprocal(l, approx=True)
            o_ref[0, :, lo:lo + d_head] = out_h.astype(o_ref.dtype)

    return kernel


# ---------------------------------------------------------------------------
# Full module forward.
# ---------------------------------------------------------------------------
def multi_head_seq_sym_attention(query, key, value, key_pe, params, nb_heads):
    Wk, Wv, Wo = params["proj_key"], params["proj_val"], params["proj_out"]
    B, M, H = query.shape
    K = nb_heads
    assert H % K == 0
    D = H // K
    L = key.shape[1]
    span = key_pe.shape[-1]
    assert L == M + span, "key/value must carry `span` steps of left memory"

    # --- projections ("Sym": q and k share proj_key); bf16 intermediates ----
    q = linear_nobias(query, Wk, out_dtype=jnp.bfloat16)   # (B, M, H)
    k = linear_nobias(key, Wk, out_dtype=jnp.bfloat16)     # (B, L, H)
    v = linear_nobias(value, Wv, out_dtype=jnp.bfloat16)   # (B, L, H)

    # --- fixed lane-dense query tile; pad M / span up to multiples of tq ----
    tq = 128
    M_p = _round_up(M, tq)
    span_p = _round_up(span, tq)
    L_p = M_p + span_p
    nq = M_p // tq
    nw = span_p // tq + 1

    if M_p != M:
        q = jnp.pad(q, ((0, 0), (0, M_p - M), (0, 0)))
    if L_p != L:
        k = jnp.pad(k, ((0, 0), (0, L_p - L), (0, 0)))
        v = jnp.pad(v, ((0, 0), (0, L_p - L), (0, 0)))
    pe = key_pe.reshape(D, span).astype(jnp.bfloat16)
    if span_p != span:
        pe = jnp.pad(pe, ((0, 0), (0, span_p - span)))

    # --- full-window banded multi-head attention -----------------------------
    in_specs = [pl.BlockSpec((1, tq, H), lambda b, qi: (b, qi, 0))]       # q
    for wi in range(nw):                                                  # k window blocks
        in_specs.append(
            pl.BlockSpec((1, tq, H), lambda b, qi, wi=wi: (b, qi + wi, 0)))
    for wi in range(nw):                                                  # v window blocks
        in_specs.append(
            pl.BlockSpec((1, tq, H), lambda b, qi, wi=wi: (b, qi + wi, 0)))
    in_specs.append(pl.BlockSpec((D, span_p), lambda b, qi: (0, 0)))      # key_pe

    attn_out = pl.pallas_call(
        _make_attn_kernel(K, D, span, span_p, tq),
        out_shape=jax.ShapeDtypeStruct((B, M_p, H), jnp.bfloat16),
        grid=(B, nq),
        in_specs=in_specs,
        out_specs=pl.BlockSpec((1, tq, H), lambda b, qi: (b, qi, 0)),
        compiler_params=pltpu.CompilerParams(
            dimension_semantics=("parallel", "parallel"),
            vmem_limit_bytes=48 * 1024 * 1024),
    )(q, *([k] * nw), *([v] * nw), pe)

    if M_p != M:
        attn_out = attn_out[:, :M, :]

    # --- output projection (bf16 activations/weights, f32 result) ------------
    return linear_nobias(attn_out, Wo.astype(jnp.bfloat16),
                         out_dtype=query.dtype)


# ---------------------------------------------------------------------------
# Pure numpy reference (float64 transcription of the PyTorch math).
# ---------------------------------------------------------------------------
def _ref_forward(query, key, value, key_pe, Wk, Wv, Wo, nb_heads):
    query, key, value, key_pe, Wk, Wv, Wo = [
        np.asarray(a, np.float64) for a in (query, key, value, key_pe, Wk, Wv, Wo)]
    B, M, H = query.shape
    K = nb_heads
    D = H // K
    S = key_pe.shape[-1]

    def heads(x):
        n = x.shape[1]
        return x.reshape(B, n, K, D).transpose(0, 2, 1, 3).reshape(B * K, n, D)

    q = heads(query @ Wk.T)
    k = heads(key @ Wk.T)
    v = heads(value @ Wv.T)
    pe = key_pe.reshape(D, S)

    win = np.arange(M)[:, None] + np.arange(S)[None, :]      # key index m + j
    cont = np.einsum('bmd,bmsd->bms', q, k[:, win, :])       # _unskew(q k^T)
    pos = np.einsum('bmd,ds->bms', q, pe)                    # q @ key_pe
    logits = (cont + pos) / math.sqrt(D)
    logits -= logits.max(-1, keepdims=True)
    e = np.exp(logits)
    attn = e / e.sum(-1, keepdims=True)
    out = np.einsum('bms,bmsd->bmd', attn, v[:, win, :])     # _skew(attn) @ v
    out = out.reshape(B, K, M, D).transpose(0, 2, 1, 3).reshape(B, M, H)
    return out @ Wo.T


if __name__ == "__main__":
    B, M, span = 2, 128, 128          # batch, segment length, attention span
    K, D = 4, 32                      # heads, head_dim
    H = K * D                         # hidden size (lane-dense last dim = 128)
    L = M + span                      # key/value length (memory + current segment)

    rng = jax.random.PRNGKey(0)
    ks = jax.random.split(rng, 7)
    scale = 1.0 / math.sqrt(H)
    Wk = jax.random.normal(ks[0], (H, H), jnp.float32) * scale
    Wv = jax.random.normal(ks[1], (H, H), jnp.float32) * scale
    Wo = jax.random.normal(ks[2], (H, H), jnp.float32) * scale
    query = jax.random.normal(ks[3], (B, M, H), jnp.float32)
    key_in = jax.random.normal(ks[4], (B, L, H), jnp.float32)
    value = jax.random.normal(ks[5], (B, L, H), jnp.float32)
    key_pe = jax.random.normal(ks[6], (1, D, span), jnp.float32)

    params = {"proj_key": Wk, "proj_val": Wv, "proj_out": Wo}
    out = multi_head_seq_sym_attention(query, key_in, value, key_pe, params, K)
    out = jax.block_until_ready(out)

    ref = _ref_forward(query, key_in, value, key_pe, Wk, Wv, Wo, K)
    # Tolerance sized for bf16 intermediates / bf16-pass MXU dots and the
    # approximate-reciprocal softmax normalisation.
    np.testing.assert_allclose(np.asarray(out, np.float64), ref, rtol=5e-2, atol=5e-2)
    print("KERNEL_OK")
</pallas_src>

<mosaic_0001>
module attributes {stable_mosaic.version = 11 : i64} {
  func.func @_linear_kernel(%arg0: i32, %arg1: i32, %arg2: i32, %arg3: memref<256x128xf32, #tpu.memory_space<vmem>>, %arg4: memref<128x128xf32, #tpu.memory_space<vmem>>, %arg5: memref<256x128xbf16, #tpu.memory_space<vmem>>, %arg6: memref<256x128xf32, #tpu.memory_space<vmem>>) attributes {dimension_semantics = [#tpu.dimension_semantics<parallel>, #tpu.dimension_semantics<parallel>, #tpu.dimension_semantics<arbitrary>], iteration_bounds = array<i64: 1, 1, 1>, scalar_prefetch = 0 : i64, scratch_operands = 1 : i64, tpu.core_type = #tpu.core_type<tc>, window_params = [{transform_indices = @transform_0, window_bounds = array<i64: 256, 128>}, {transform_indices = @transform_1, window_bounds = array<i64: 128, 128>}, {transform_indices = @transform_2, window_bounds = array<i64: 256, 128>}]} {
    %c0_i32 = arith.constant 0 : i32
    %0 = arith.cmpi eq, %arg2, %c0_i32 : i32
    %1 = arith.extui %0 : i1 to i32
    %c0_i32_0 = arith.constant 0 : i32
    %2 = arith.cmpi ne, %1, %c0_i32_0 : i32
    scf.if %2 {
      %cst_10 = arith.constant 0.000000e+00 : f32
      %12 = vector.broadcast %cst_10 : f32 to vector<256x128xf32>
      %c0_11 = arith.constant 0 : index
      %c0_12 = arith.constant 0 : index
      %13 = vector.load %arg6[%c0_11, %c0_12] : memref<256x128xf32, #tpu.memory_space<vmem>>, vector<256x128xf32>
      tpu.vector_store %arg6[%c0_11, %c0_12], %12 {strides = array<i32>} : memref<256x128xf32, #tpu.memory_space<vmem>>, vector<256x128xf32>,
    } else {
    }
    %c0 = arith.constant 0 : index
    %c0_1 = arith.constant 0 : index
    %3 = vector.load %arg6[%c0, %c0_1] : memref<256x128xf32, #tpu.memory_space<vmem>>, vector<256x128xf32>
    %c0_2 = arith.constant 0 : index
    %c0_3 = arith.constant 0 : index
    %4 = vector.load %arg3[%c0_2, %c0_3] : memref<256x128xf32, #tpu.memory_space<vmem>>, vector<256x128xf32>
    %c0_4 = arith.constant 0 : index
    %c0_5 = arith.constant 0 : index
    %5 = vector.load %arg4[%c0_4, %c0_5] : memref<128x128xf32, #tpu.memory_space<vmem>>, vector<128x128xf32>
    %cst = arith.constant dense<0.000000e+00> : vector<256x128xf32>
    %6 = tpu.matmul %4, %5, %cst {dimension_numbers = #tpu.dot_dimension_numbers<[1], [1], [0], [0], [0, 0, 1, 0], [], []>} : vector<256x128xf32>, vector<128x128xf32>, vector<256x128xf32> -> vector<256x128xf32>
    %7 = arith.addf %3, %6 : vector<256x128xf32>
    %c0_6 = arith.constant 0 : index
    %c0_7 = arith.constant 0 : index
    %8 = vector.load %arg6[%c0_6, %c0_7] : memref<256x128xf32, #tpu.memory_space<vmem>>, vector<256x128xf32>
    tpu.vector_store %arg6[%c0_6, %c0_7], %7 {strides = array<i32>} : memref<256x128xf32, #tpu.memory_space<vmem>>, vector<256x128xf32>,
    %c0_i32_8 = arith.constant 0 : i32
    %9 = arith.cmpi eq, %arg2, %c0_i32_8 : i32
    %10 = arith.extui %9 : i1 to i32
    %c0_i32_9 = arith.constant 0 : i32
    %11 = arith.cmpi ne, %10, %c0_i32_9 : i32
    scf.if %11 {
      %c0_10 = arith.constant 0 : index
      %c0_11 = arith.constant 0 : index
      %12 = vector.load %arg6[%c0_10, %c0_11] : memref<256x128xf32, #tpu.memory_space<vmem>>, vector<256x128xf32>
      %13 = arith.truncf %12 : vector<256x128xf32> to vector<256x128xbf16>
      %c0_12 = arith.constant 0 : index
      %c0_13 = arith.constant 0 : index
      %14 = vector.load %arg5[%c0_12, %c0_13] : memref<256x128xbf16, #tpu.memory_space<vmem>>, vector<256x128xbf16>
      tpu.vector_store %arg5[%c0_12, %c0_13], %13 {strides = array<i32>} : memref<256x128xbf16, #tpu.memory_space<vmem>>, vector<256x128xbf16>,
    } else {
    }
    return
  }
  func.func @transform_0(%arg0: i32, %arg1: i32, %arg2: i32) -> (i32, i32) {
    %c0_i32 = arith.constant 0 : i32
    return %arg0, %arg2 : i32, i32
  }
  func.func @transform_1(%arg0: i32, %arg1: i32, %arg2: i32) -> (i32, i32) {
    %c0_i32 = arith.constant 0 : i32
    return %arg1, %arg2 : i32, i32
  }
  func.func @transform_2(%arg0: i32, %arg1: i32, %arg2: i32) -> (i32, i32) {
    %c0_i32 = arith.constant 0 : i32
    return %arg0, %arg1 : i32, i32
  }
}

</mosaic_0001>

<bundles_post_ra>
// kernel: tpu_custom_call.1
= control target key start
LH: loop header
LB: loop body
LE: loop exit
PB: predicated region body
PF: predicated region fallthrough
CT: control target
= control target key end

     0   :  { %7 = vsyncpa [#allocation4], 0  ;;  %s1130_s0 = inlined_call_operand.hbm [shape: f32[256,128], index: 0, kind: input, shape index: {}]   ;;  %s1131_s1 = inlined_call_operand.hbm [shape: f32[128,128], index: 1, kind: input, shape index: {}]   ;;  %s1132_s2 = inlined_call_operand.hbm [shape: bf16[256,128], index: 2, kind: output, shape index: {}]  }
   0x1   :  { %8 = vsyncpa [#allocation7], 0 }
   0x2   :  { %9 = vsyncpa [#allocation5], 0  ;;  %s1072_s9 = smov [#allocation3]   ;;  %s1000_s13 = scalar_lea.hbm %s1130_s0, 4096 }
   0x3   :  { %s15_s10 = sshll.u32 %s1072_s9, 4  ;;  %p1001_p0 = scmp.ne.s32.totalorder %s1130_s0, %s1000_s13  ;;  %s16_s10 = int_to_ptr.vmem [resolvable:$true] %s15_s10 }
   0x4   :  { %p1004_p1 = scmp.lt.u32.totalorder %s1000_s13, %s1130_s0 }
   0x6   :  { %p1006_p2 = pnand %p1004_p1, %p1001_p0 }
   0x8   :  { %1009 = shalt.err (!%p1006_p2)
}
   0x9   :  { %s1010_s18 = scalar_lea.vmem %s16_s10, 4096  ;;  %p1015_p4 = scmp.lt.s32.totalorder %s16_s10, %s16_s10 }
   0xa   :  { %p1011_p3 = scmp.ne.s32.totalorder %s16_s10, %s1010_s18  ;;  %p1016_p5 = scmp.lt.s32.totalorder %s1010_s18, %s1010_s18 }
   0xc   :  { %p1017_p6 = por %p1016_p5, %p1015_p4 }
   0xe   :  { %p1018_p7 = pnand %p1017_p6, %p1011_p3 }
  0x10   :  { %1021 = shalt.err (!%p1018_p7)
}
  0x11   :  { %s1073_s19 = smov 128   ;;  %s1074_s20 = smov 8  }
  0x12   :  { %21 = dma.hbm_to_vmem [thread:$0]  %s1130_s0, 4096, %s16_s10, [#allocation4], %s1073_s19, %s1073_s19, %s1074_s20  }
  0x13   :  { %s1075_s23 = smov [#allocation6]   ;;  %s1022_s27 = scalar_lea.hbm %s1131_s1, 2048 }
  0x14   :  { %s27_s24 = sshll.u32 %s1075_s23, 4  ;;  %p1023_p8 = scmp.ne.s32.totalorder %s1131_s1, %s1022_s27  ;;  %s28_s24 = int_to_ptr.vmem [resolvable:$true] %s27_s24 }
  0x15   :  { %p1026_p9 = scmp.lt.u32.totalorder %s1022_s27, %s1131_s1 }
  0x17   :  { %p1028_p10 = pnand %p1026_p9, %p1023_p8 }
  0x19   :  { %1031 = shalt.err (!%p1028_p10)
}
  0x1a   :  { %s1032_s4 = scalar_lea.vmem %s28_s24, 2048  ;;  %p1037_p12 = scmp.lt.s32.totalorder %s28_s24, %s28_s24 }
  0x1b   :  { %p1033_p11 = scmp.ne.s32.totalorder %s28_s24, %s1032_s4  ;;  %p1038_p13 = scmp.lt.s32.totalorder %s1032_s4, %s1032_s4 }
  0x1d   :  { %p1039_p0 = por %p1038_p13, %p1037_p12 }
  0x1f   :  { %p1040_p1 = pnand %p1039_p0, %p1033_p11 }
  0x21   :  { %1043 = shalt.err (!%p1040_p1)
}
  0x22   :  { %33 = dma.hbm_to_vmem [thread:$0]  %s1131_s1, 2048, %s28_s24, [#allocation7], %s1073_s19, %s1073_s19, %s1074_s20  }
  0x23   :  { %1066 = dma.done.wait [#allocation4], 4096  }
  0x24   :  { %1067 = vsyncadd [#allocation4], 4294963200 }
  0x25   :  { %1068 = dma.done.wait [#allocation7], 2048  }
  0x26   :  { %1069 = vsyncadd [#allocation7], 4294965248  ;;  %v140_v0 = vld [vmem:[#allocation6] sm:$0xff]  ;;  %v141_v1 = vld [vmem:[#allocation6 + $0x8] sm:$0xff]  ;;  %s1076_s1 = smov [#allocation8]  }
  0x27   :  { %v142_v2 = vld [vmem:[#allocation6 + $0x10] sm:$0xff]  ;;  %v945_v3 = vpack.c.bf16 %v141_v1, %v140_v0  ;;  %v143_v4 = vld [vmem:[#allocation6 + $0x18] sm:$0xff]  ;;  %v108_v6 = vld [vmem:[#allocation3] sm:$0xff]  ;;  %s645_s6 = sshll.u32 %s1076_s1, 4  ;;  %s646_s6 = int_to_ptr.vmem [resolvable:$true] %s645_s6 }
  0x28   :  { %v949_v5 = vpack.c.bf16 %v143_v4, %v142_v2  ;;  %v124_v7 = vld [vmem:[#allocation3 + $0x80] sm:$0xff]  ;;  %v145_v9 = vld [vmem:[#allocation6 + $0x28] sm:$0xff]  ;;  %897 = vmatprep.mubr.f32.mxu0 %v108_v6  ;;  %v146_v11 = vld [vmem:[#allocation6 + $0x30] sm:$0xff]  ;;  %s1044_s7 = scalar_lea.vmem %s646_s6, 2048  ;;  %p1049_p3 = scmp.lt.s32.totalorder %s646_s6, %s646_s6 }
  0x29   :  { %946 = vmatprep.subr.bf16.mxu0 %v945_v3  ;;  %977 = vmatprep.subr.bf16.mxu1 %v945_v3  ;;  %v144_v8 = vld [vmem:[#allocation6 + $0x20] sm:$0xff]  ;;  %v147_v12 = vld [vmem:[#allocation6 + $0x38] sm:$0xff]  ;;  %v149_v15 = vld [vmem:[#allocation6 + $0x48] sm:$0xff]  ;;  %p1045_p2 = scmp.ne.s32.totalorder %s646_s6, %s1044_s7  ;;  %p1050_p4 = scmp.lt.s32.totalorder %s1044_s7, %s1044_s7 }
  0x2a   :  { %948 = vmatpush3.bf16.xpose.msra.mxu0 %v945_v3  ;;  %985 = vmatpush3.bf16.xpose.msra.mxu1 %v945_v3  ;;  %v953_v10 = vpack.c.bf16 %v145_v9, %v144_v8  ;;  %v957_v13 = vpack.c.bf16 %v147_v12, %v146_v11  ;;  %v148_v14 = vld [vmem:[#allocation6 + $0x40] sm:$0xff]  ;;  %v150_v17 = vld [vmem:[#allocation6 + $0x50] sm:$0xff]  ;;  %v151_v18 = vld [vmem:[#allocation6 + $0x58] sm:$0xff] }
  0x2b   :  { %950 = vmatprep.subr.bf16.mxu0 %v949_v5  ;;  %978 = vmatprep.subr.bf16.mxu1 %v949_v5  ;;  %v961_v16 = vpack.c.bf16 %v149_v15, %v148_v14  ;;  %v965_v19 = vpack.c.bf16 %v151_v18, %v150_v17  ;;  %v152_v20 = vld [vmem:[#allocation6 + $0x60] sm:$0xff]  ;;  %v153_v21 = vld [vmem:[#allocation6 + $0x68] sm:$0xff]  ;;  %v154_v23 = vld [vmem:[#allocation6 + $0x70] sm:$0xff]  ;;  %p1051_p5 = por %p1050_p4, %p1049_p3 }
  0x2c   :  { %921 = vmatprep.mubr.f32.mxu1 %v124_v7  ;;  %v969_v22 = vpack.c.bf16 %v153_v21, %v152_v20  ;;  %v155_v24 = vld [vmem:[#allocation6 + $0x78] sm:$0xff]  ;;  %v109_v26 = vld [vmem:[#allocation3 + $0x8] sm:$0xff]  ;;  %v110_v28 = vld [vmem:[#allocation3 + $0x10] sm:$0xff] }
  0x2d   :  { %v973_v25 = vpack.c.bf16 %v155_v24, %v154_v23  ;;  %v125_v27 = vld [vmem:[#allocation3 + $0x88] sm:$0xff]  ;;  %v126_v29 = vld [vmem:[#allocation3 + $0x90] sm:$0xff]  ;;  %v111_v30 = vld [vmem:[#allocation3 + $0x18] sm:$0xff]  ;;  %p1052_p6 = pnand %p1051_p5, %p1045_p2 }
  0x2e   :  { %v127_v31 = vld [vmem:[#allocation3 + $0x98] sm:$0xff]  ;;  %v112_v32 = vld [vmem:[#allocation3 + $0x20] sm:$0xff]  ;;  %v113_v34 = vld [vmem:[#allocation3 + $0x28] sm:$0xff] }
  0x2f   :  { %v128_v33 = vld [vmem:[#allocation3 + $0xa0] sm:$0xff]  ;;  %v129_v35 = vld [vmem:[#allocation3 + $0xa8] sm:$0xff]  ;;  %v114_v36 = vld [vmem:[#allocation3 + $0x30] sm:$0xff] }
  0x30   :  { %v130_v37 = vld [vmem:[#allocation3 + $0xb0] sm:$0xff]  ;;  %v115_v38 = vld [vmem:[#allocation3 + $0x38] sm:$0xff]  ;;  %v116_v40 = vld [vmem:[#allocation3 + $0x40] sm:$0xff] }
  0x31   :  { %v131_v39 = vld [vmem:[#allocation3 + $0xb8] sm:$0xff]  ;;  %v132_v41 = vld [vmem:[#allocation3 + $0xc0] sm:$0xff]  ;;  %v117_v42 = vld [vmem:[#allocation3 + $0x48] sm:$0xff] }
  0x32   :  { %952 = vmatpush3.bf16.xpose.msra.mxu0 %v949_v5  ;;  %986 = vmatpush3.bf16.xpose.msra.mxu1 %v949_v5  ;;  %v133_v43 = vld [vmem:[#allocation3 + $0xc8] sm:$0xff]  ;;  %v118_v44 = vld [vmem:[#allocation3 + $0x50] sm:$0xff]  ;;  %v119_v46 = vld [vmem:[#allocation3 + $0x58] sm:$0xff] }
  0x33   :  { %954 = vmatprep.subr.bf16.mxu0 %v953_v10  ;;  %979 = vmatprep.subr.bf16.mxu1 %v953_v10  ;;  %v134_v45 = vld [vmem:[#allocation3 + $0xd0] sm:$0xff]  ;;  %v135_v47 = vld [vmem:[#allocation3 + $0xd8] sm:$0xff]  ;;  %v120_v48 = vld [vmem:[#allocation3 + $0x60] sm:$0xff] }
  0x34   :  { %v136_v49 = vld [vmem:[#allocation3 + $0xe0] sm:$0xff]  ;;  %v121_v50 = vld [vmem:[#allocation3 + $0x68] sm:$0xff]  ;;  %v122_v52 = vld [vmem:[#allocation3 + $0x70] sm:$0xff] }
  0x35   :  { %v137_v51 = vld [vmem:[#allocation3 + $0xe8] sm:$0xff]  ;;  %v138_v53 = vld [vmem:[#allocation3 + $0xf0] sm:$0xff]  ;;  %v123_v54 = vld [vmem:[#allocation3 + $0x78] sm:$0xff] }
  0x36   :  { %v139_v55 = vld [vmem:[#allocation3 + $0xf8] sm:$0xff] }
  0x3a   :  { %956 = vmatpush3.bf16.xpose.msra.mxu0 %v953_v10  ;;  %987 = vmatpush3.bf16.xpose.msra.mxu1 %v953_v10 }
  0x3b   :  { %958 = vmatprep.subr.bf16.mxu0 %v957_v13  ;;  %980 = vmatprep.subr.bf16.mxu1 %v957_v13 }
  0x42   :  { %960 = vmatpush3.bf16.xpose.msra.mxu0 %v957_v13  ;;  %988 = vmatpush3.bf16.xpose.msra.mxu1 %v957_v13 }
  0x43   :  { %962 = vmatprep.subr.bf16.mxu0 %v961_v16  ;;  %981 = vmatprep.subr.bf16.mxu1 %v961_v16 }
  0x4a   :  { %964 = vmatpush3.bf16.xpose.msra.mxu0 %v961_v16  ;;  %989 = vmatpush3.bf16.xpose.msra.mxu1 %v961_v16 }
  0x4b   :  { %966 = vmatprep.subr.bf16.mxu0 %v965_v19  ;;  %982 = vmatprep.subr.bf16.mxu1 %v965_v19 }
  0x52   :  { %968 = vmatpush3.bf16.xpose.msra.mxu0 %v965_v19  ;;  %990 = vmatpush3.bf16.xpose.msra.mxu1 %v965_v19 }
  0x53   :  { %970 = vmatprep.subr.bf16.mxu0 %v969_v22  ;;  %983 = vmatprep.subr.bf16.mxu1 %v969_v22 }
  0x5a   :  { %972 = vmatpush3.bf16.xpose.msra.mxu0 %v969_v22  ;;  %991 = vmatpush3.bf16.xpose.msra.mxu1 %v969_v22 }
  0x5b   :  { %974 = vmatprep.subr.bf16.mxu0 %v973_v25  ;;  %984 = vmatprep.subr.bf16.mxu1 %v973_v25 }
  0x62   :  { %976 = vmatpush3.bf16.xpose.msra.mxu0 %v973_v25  ;;  %992 = vmatpush3.bf16.xpose.msra.mxu1 %v973_v25 }
  0x69   :  { %898 = vmatmul.mubr.f32.vlgmr.msra.gmra.mrb[0].mxu0 %v109_v26  ;;  %922 = vmatmul.mubr.f32.vlgmr.msra.gmra.mrb[0].mxu1 %v125_v27 }
  0x6a   :  { %900 = vmatprep.mubr.f32.mxu0 %v110_v28  ;;  %924 = vmatprep.mubr.f32.mxu1 %v126_v29 }
  0x6d   :  { %901 = vmatmul.mubr.f32.gmra.mrb[2].mxu0 %v111_v30  ;;  %925 = vmatmul.mubr.f32.gmra.mrb[2].mxu1 %v127_v31 }
  0x6e   :  { %903 = vmatprep.mubr.f32.mxu0 %v112_v32  ;;  %927 = vmatprep.mubr.f32.mxu1 %v128_v33 }
  0x71   :  { %904 = vmatmul.mubr.f32.gmra.mrb[4].mxu0 %v113_v34  ;;  %928 = vmatmul.mubr.f32.gmra.mrb[4].mxu1 %v129_v35 }
  0x72   :  { %906 = vmatprep.mubr.f32.mxu0 %v114_v36  ;;  %930 = vmatprep.mubr.f32.mxu1 %v130_v37 }
  0x75   :  { %907 = vmatmul.mubr.f32.gmra.mrb[6].mxu0 %v115_v38  ;;  %931 = vmatmul.mubr.f32.gmra.mrb[6].mxu1 %v131_v39 }
  0x76   :  { %909 = vmatprep.mubr.f32.mxu0 %v116_v40  ;;  %933 = vmatprep.mubr.f32.mxu1 %v132_v41 }
  0x79   :  { %910 = vmatmul.mubr.f32.gmra.mrb[8].mxu0 %v117_v42  ;;  %934 = vmatmul.mubr.f32.gmra.mrb[8].mxu1 %v133_v43 }
  0x7a   :  { %912 = vmatprep.mubr.f32.mxu0 %v118_v44  ;;  %936 = vmatprep.mubr.f32.mxu1 %v134_v45 }
  0x7d   :  { %913 = vmatmul.mubr.f32.gmra.mrb[10].mxu0 %v119_v46  ;;  %937 = vmatmul.mubr.f32.gmra.mrb[10].mxu1 %v135_v47 }
  0x7e   :  { %915 = vmatprep.mubr.f32.mxu0 %v120_v48  ;;  %939 = vmatprep.mubr.f32.mxu1 %v136_v49 }
  0x81   :  { %916 = vmatmul.mubr.f32.gmra.mrb[12].mxu0 %v121_v50  ;;  %940 = vmatmul.mubr.f32.gmra.mrb[12].mxu1 %v137_v51 }
  0x82   :  { %918 = vmatprep.mubr.f32.mxu0 %v122_v52  ;;  %942 = vmatprep.mubr.f32.mxu1 %v138_v53 }
  0x85   :  { %919 = vmatmul.mubr.f32.gmra.mrb[14].mxu0 %v123_v54  ;;  %943 = vmatmul.mubr.f32.gmra.mrb[14].mxu1 %v139_v55 }
 0x13c   :  { %v899_v56 = vpop.f32.mrb[0].mxu0  ;;  %v923_v57 = vpop.f32.mrb[0].mxu1 }
 0x13d   :  { %v222_v58 = vpop.f32.mrb[1].mxu0  ;;  %v302_v59 = vpop.f32.mrb[1].mxu1 }
 0x13e   :  { %v725_v60 = vpack.c.bf16 %v899_v56, %v222_v58  ;;  %v765_v61 = vpack.c.bf16 %v923_v57, %v302_v59 }
 0x140   :  { %726 = vst [vmem:[#allocation8] sm:$0xff] %v725_v60   ;;  %809 = vst [vmem:[#allocation8 + $0x40] sm:$0xff] %v765_v61   ;;  %v902_v62 = vpop.f32.mrb[2].mxu0  ;;  %v926_v63 = vpop.f32.mrb[2].mxu1 }
 0x141   :  { %v232_v0 = vpop.f32.mrb[3].mxu0  ;;  %v312_v1 = vpop.f32.mrb[3].mxu1 }
 0x142   :  { %v730_v2 = vpack.c.bf16 %v902_v62, %v232_v0  ;;  %v770_v3 = vpack.c.bf16 %v926_v63, %v312_v1 }
 0x144   :  { %802 = vst [vmem:[#allocation8 + $0x8] sm:$0xff] %v730_v2   ;;  %810 = vst [vmem:[#allocation8 + $0x48] sm:$0xff] %v770_v3   ;;  %v905_v4 = vpop.f32.mrb[4].mxu0  ;;  %v929_v5 = vpop.f32.mrb[4].mxu1 }
 0x145   :  { %v242_v6 = vpop.f32.mrb[5].mxu0  ;;  %v322_v7 = vpop.f32.mrb[5].mxu1 }
 0x146   :  { %v735_v8 = vpack.c.bf16 %v905_v4, %v242_v6  ;;  %v775_v9 = vpack.c.bf16 %v929_v5, %v322_v7 }
 0x148   :  { %803 = vst [vmem:[#allocation8 + $0x10] sm:$0xff] %v735_v8   ;;  %811 = vst [vmem:[#allocation8 + $0x50] sm:$0xff] %v775_v9   ;;  %v908_v10 = vpop.f32.mrb[6].mxu0  ;;  %v932_v11 = vpop.f32.mrb[6].mxu1 }
 0x149   :  { %v252_v12 = vpop.f32.mrb[7].mxu0  ;;  %v332_v13 = vpop.f32.mrb[7].mxu1 }
 0x14a   :  { %v740_v14 = vpack.c.bf16 %v908_v10, %v252_v12  ;;  %v780_v15 = vpack.c.bf16 %v932_v11, %v332_v13 }
 0x14c   :  { %804 = vst [vmem:[#allocation8 + $0x18] sm:$0xff] %v740_v14   ;;  %812 = vst [vmem:[#allocation8 + $0x58] sm:$0xff] %v780_v15   ;;  %v911_v16 = vpop.f32.mrb[8].mxu0  ;;  %v935_v17 = vpop.f32.mrb[8].mxu1 }
 0x14d   :  { %v262_v18 = vpop.f32.mrb[9].mxu0  ;;  %v342_v19 = vpop.f32.mrb[9].mxu1 }
 0x14e   :  { %v745_v20 = vpack.c.bf16 %v911_v16, %v262_v18  ;;  %v785_v21 = vpack.c.bf16 %v935_v17, %v342_v19 }
 0x150   :  { %805 = vst [vmem:[#allocation8 + $0x20] sm:$0xff] %v745_v20   ;;  %813 = vst [vmem:[#allocation8 + $0x60] sm:$0xff] %v785_v21   ;;  %v914_v22 = vpop.f32.mrb[10].mxu0  ;;  %v938_v23 = vpop.f32.mrb[10].mxu1 }
 0x151   :  { %v272_v24 = vpop.f32.mrb[11].mxu0  ;;  %v352_v25 = vpop.f32.mrb[11].mxu1 }
 0x152   :  { %v750_v26 = vpack.c.bf16 %v914_v22, %v272_v24  ;;  %v790_v27 = vpack.c.bf16 %v938_v23, %v352_v25 }
 0x154   :  { %806 = vst [vmem:[#allocation8 + $0x28] sm:$0xff] %v750_v26   ;;  %814 = vst [vmem:[#allocation8 + $0x68] sm:$0xff] %v790_v27   ;;  %v917_v28 = vpop.f32.mrb[12].mxu0  ;;  %v941_v29 = vpop.f32.mrb[12].mxu1 }
 0x155   :  { %v282_v30 = vpop.f32.mrb[13].mxu0  ;;  %v362_v31 = vpop.f32.mrb[13].mxu1 }
 0x156   :  { %v755_v32 = vpack.c.bf16 %v917_v28, %v282_v30  ;;  %v795_v33 = vpack.c.bf16 %v941_v29, %v362_v31 }
 0x158   :  { %807 = vst [vmem:[#allocation8 + $0x30] sm:$0xff] %v755_v32   ;;  %815 = vst [vmem:[#allocation8 + $0x70] sm:$0xff] %v795_v33   ;;  %v920_v34 = vpop.f32.mrb[14].mxu0  ;;  %v944_v35 = vpop.f32.mrb[14].mxu1 }
 0x159   :  { %v292_v36 = vpop.f32.mrb[15].mxu0  ;;  %v372_v37 = vpop.f32.mrb[15].mxu1 }
 0x15a   :  { %v760_v38 = vpack.c.bf16 %v920_v34, %v292_v36  ;;  %v800_v39 = vpack.c.bf16 %v944_v35, %v372_v37 }
 0x15c   :  { %808 = vst [vmem:[#allocation8 + $0x38] sm:$0xff] %v760_v38   ;;  %816 = vst [vmem:[#allocation8 + $0x78] sm:$0xff] %v800_v39  }
 0x15d   :  { %1055 = shalt.err (!%p1052_p6)
}
 0x15e   :  { %s1056_s10 = scalar_lea.hbm %s1132_s2, 2048 }
 0x15f   :  { %p1057_p7 = scmp.ne.s32.totalorder %s1132_s2, %s1056_s10  ;;  %p1060_p8 = scmp.lt.u32.totalorder %s1056_s10, %s1132_s2 }
 0x161   :  { %p1062_p9 = pnand %p1060_p8, %p1057_p7 }
 0x163   :  { %1065 = shalt.err (!%p1062_p9)
}
 0x164   :  { %s1077_s15 = smov 64   ;;  %s1078_s16 = smov 4  }
 0x165   :  { %651 = dma.vmem_to_hbm [thread:$0]  %s646_s6, 2048, %s1132_s2, [#allocation5], %s1077_s15, %s1077_s15, %s1078_s16  }
 0x166   :  { %1070 = dma.done.wait [#allocation5], 2048  }
 0x167   :  { %1071 = vsyncadd [#allocation5], 4294965248 }
 0x168   :  { %655 = vsyncpa [#allocation4], 1 }
 0x169   :  { %656 = vsyncpa [#allocation7], 1 }
 0x16a   :  { %657 = vsyncpa [#allocation5], 1 }

</bundles_post_ra>
